<compile_context>
chip_gen: v5e
topology: v5e:2x2
jax: 0.10.0
libtpu: 0.0.40
codegen_flags: <defaults>
</compile_context>

<pallas_src>
import functools

import numpy as np
import jax
import jax.numpy as jnp
from jax.experimental import pallas as pl
from jax.experimental.pallas import tpu as pltpu


# ---------------------------------------------------------------------------
# Pallas kernel: attn = softmax( (Q * scale/temp) @ K^T + key_pad_bias, axis=-1 )
# ---------------------------------------------------------------------------
def _attn_softmax_kernel(q_ref, k_ref, bias_ref, o_ref, *, qk_scale):
    q = q_ref[0]                                   # [TQ, D]   compute dtype
    k = k_ref[0]                                   # [N_p, D]  compute dtype
    if qk_scale != 1.0:
        # scale Q (TQ x D VALU work) instead of sim (TQ x N); round back to MXU dtype
        q = (q.astype(jnp.float32) * qk_scale).astype(q.dtype)
    # contraction on the last dim of both operands -> no in-kernel K transpose
    sim = jax.lax.dot_general(
        q, k, (((1,), (1,)), ((), ())),
        preferred_element_type=jnp.float32)        # [TQ, N_p] f32
    sim = sim + bias_ref[...]                      # 0 for valid keys, -inf for lane padding
    m = jnp.max(sim, axis=-1, keepdims=True)
    e = jnp.exp(sim - m)
    s = jnp.sum(e, axis=-1, keepdims=True)
    o_ref[0] = (e * pl.reciprocal(s, approx=True)).astype(o_ref.dtype)


def _round_up(x, m):
    return (x + m - 1) // m * m


def _choose_tiling(n_q, n_p, d, in_bytes, out_bytes, sub, budget):
    """Pick (query tile, K buffer count) under the generation's VMEM budget."""

    def vmem(tq, k_bufs):
        out = 2 * tq * n_p * out_bytes             # double-buffered output blocks
        kbuf = k_bufs * n_p * d * in_bytes          # K buffers (resident per batch)
        qbuf = 2 * tq * d * in_bytes                # double-buffered Q blocks
        interm = 3 * tq * n_p * 4                   # f32 sim / e intermediates + slack
        return out + kbuf + qbuf + interm + 2 * n_p * 4

    if n_q >= 512 and vmem(512, 2) <= budget:       # measured sweet spot on v5e/v6e
        tq = 512
    elif n_q >= 256:
        tq = 256                                    # v6e/v7x 256x256 MXU native
    else:
        tq = _round_up(max(n_q, 1), sub)

    k_bufs = 2
    while vmem(tq, k_bufs) > budget and tq > sub:
        tq = max(sub, _round_up(tq // 2, sub))
    if vmem(tq, k_bufs) > budget:
        k_bufs = 1          # K block index only changes at batch boundaries; single-buffer
    # TODO(synk): if even (tq=sub, k_bufs=1) exceeds the budget (v7x with very large N),
    # switch to a key-tiled online-softmax (flash-style) accumulator so VMEM is
    # O(tq*tk) independent of N instead of shrinking tq further.
    return tq, k_bufs


def batched_attention_softmax_pallas(queries, keys, *, scale=1.0, temp_softmax=1.0,
                                     compute_dtype=jnp.bfloat16,
                                     out_dtype=jnp.bfloat16):
    """queries: [B, Nq, D], keys: [B, N, D].

    Returns softmax(Q K^T * scale / temp) PADDED to [B, round_up(Nq, tq),
    round_up(N, 128)]; the caller slices the valid [:Nq, :N] region (kept padded
    here to avoid an extra full-array HBM copy pass before per-batch gathers)."""
    b, n_q, d = queries.shape
    _, n, _ = keys.shape

    in_bytes = jnp.dtype(compute_dtype).itemsize
    out_bytes = jnp.dtype(out_dtype).itemsize
    sub = 8 if (in_bytes == 4 and out_bytes == 4) else 16

    n_p = _round_up(max(n, 1), 128)                 # lane-dense output stores

    # generation-aware VMEM sizing: 128 MiB on v5e/v6e, 64 MiB on v7x
    try:
        vmem_cap = pltpu.get_tpu_info().vmem_capacity_bytes
    except Exception:
        vmem_cap = 64 * 1024 * 1024                 # conservative (v7x-safe) fallback
    budget = int(vmem_cap * 0.70)                   # tiling decision headroom
    vmem_limit = int(vmem_cap * 0.80)               # Mosaic scoped-VMEM limit

    tq, k_bufs = _choose_tiling(n_q, n_p, d, in_bytes, out_bytes, sub, budget)
    n_q_p = _round_up(max(n_q, 1), tq)

    q = queries.astype(compute_dtype)
    if n_q_p != n_q:
        q = jnp.pad(q, ((0, 0), (0, n_q_p - n_q), (0, 0)))
    k = keys.astype(compute_dtype)
    if n_p != n:
        k = jnp.pad(k, ((0, 0), (0, n_p - n), (0, 0)))
    # key-padding bias hoisted out of the per-tile body (0 valid / -inf padded cols)
    bias = jnp.asarray(np.where(np.arange(n_p) < n, 0.0, -np.inf).reshape(1, n_p),
                       dtype=jnp.float32)

    kernel = functools.partial(
        _attn_softmax_kernel,
        qk_scale=float(scale) / float(temp_softmax))

    k_index_map = lambda bi, qi: (bi, 0, 0)         # K resident per batch
    if k_bufs == 2:
        k_spec = pl.BlockSpec((1, n_p, d), k_index_map)
    else:
        k_spec = pl.BlockSpec((1, n_p, d), k_index_map,
                              pipeline_mode=pl.Buffered(k_bufs))

    cost = pl.CostEstimate(
        flops=2 * b * n_q_p * n_p * d + 4 * b * n_q_p * n_p,
        transcendentals=b * n_q_p * n_p,
        bytes_accessed=(b * n_q_p * d * in_bytes + b * n_p * d * in_bytes
                        + n_p * 4 + b * n_q_p * n_p * out_bytes))

    out = pl.pallas_call(
        kernel,
        out_shape=jax.ShapeDtypeStruct((b, n_q_p, n_p), out_dtype),
        grid=(b, n_q_p // tq),
        in_specs=[
            pl.BlockSpec((1, tq, d), lambda bi, qi: (bi, qi, 0)),    # Q tile (D unpadded)
            k_spec,
            pl.BlockSpec((1, n_p), lambda bi, qi: (0, 0)),           # key-pad bias row
        ],
        out_specs=pl.BlockSpec((1, tq, n_p), lambda bi, qi: (bi, qi, 0)),
        compiler_params=pltpu.CompilerParams(
            dimension_semantics=("parallel", "parallel"),
            vmem_limit_bytes=vmem_limit),
        cost_estimate=cost,
    )(q, k, bias)
    return out                                       # padded [B, n_q_p, n_p]


# ---------------------------------------------------------------------------
# JAX glue mirroring the PyTorch module
# ---------------------------------------------------------------------------
def _bilinear_resize_nchw(x, out_h, out_w):
    # F.interpolate(mode='bilinear', align_corners=False, antialias=False)
    b, c, _, _ = x.shape
    return jax.image.resize(x, (b, c, out_h, out_w), method="bilinear",
                            antialias=False)


def _pool_mask(mask, r, pool_type):
    # mask: [B, 1, H, W] in {0, 1}; kernel = stride = r, padding = 0
    b, _, h, w = mask.shape
    blocks = mask.reshape(b, 1, h // r, r, w // r, r)
    if pool_type == "average":
        return blocks.mean(axis=(3, 5))
    elif pool_type == "max":
        return blocks.max(axis=(3, 5))
    elif pool_type == "min":
        return blocks.min(axis=(3, 5))
    else:
        raise NotImplementedError(pool_type)


def training_free_attention_forward(features, features_ref, roi_mask,
                                    res_ratio=4, pool_type="average",
                                    temp_softmax=1.0, use_scale=False,
                                    compute_dtype=jnp.bfloat16,
                                    out_dtype=jnp.bfloat16,
                                    check_mask=False):
    """Returns a list (len B) of attention maps [C_q_b, H_attn, W_attn]."""
    b, _, h, w = roi_mask.shape
    if res_ratio is None:
        h_attn, w_attn = features.shape[2], features.shape[3]
        r = h // h_attn
    else:
        h_attn, w_attn = h // res_ratio, w // res_ratio
        r = res_ratio
        features = _bilinear_resize_nchw(features, h_attn, w_attn)
        features_ref = _bilinear_resize_nchw(features_ref, h_attn, w_attn)

    c = features.shape[1]
    n = h_attn * w_attn
    pooled = _pool_mask(roi_mask, r, pool_type)                           # [B,1,h_attn,w_attn]

    if check_mask:
        # mirrors the PyTorch assert (forces a device->host sync)
        assert bool(jnp.all(jnp.logical_or(roi_mask == 0, roi_mask == 1)))

    # Small host transfer of the pooled mask: required anyway to build the
    # variable-length per-batch outputs; reused here to gather ONLY the valid
    # ROI query rows so MXU flops and the dominant [Nq, N] writeback scale with
    # the ROI density instead of always running all N query positions.
    pooled_np = np.asarray(pooled).reshape(b, -1)
    valid_idx = [np.nonzero(pooled_np[i] > 0)[0] for i in range(b)]
    counts = [int(v.shape[0]) for v in valid_idx]
    nq = max(max(counts), 1)                                              # static max count
    idx_np = np.zeros((b, nq), dtype=np.int32)
    for i in range(b):
        idx_np[i, :counts[i]] = valid_idx[i]
    idx = jnp.asarray(idx_np)

    keys = features.reshape(b, c, n).transpose(0, 2, 1)                   # [B, N, C]
    q_all = (features_ref * pooled).reshape(b, c, n).transpose(0, 2, 1)   # [B, N, C]
    queries = jnp.take_along_axis(q_all, idx[:, :, None], axis=1)         # [B, nq, C]

    scale = float(c) ** (-0.5) if use_scale else 1.0

    attn_pad = batched_attention_softmax_pallas(
        queries, keys, scale=scale, temp_softmax=temp_softmax,
        compute_dtype=compute_dtype, out_dtype=out_dtype)                 # [B, nq_p, n_p]

    # per-batch static slices of the padded output (no bulk full-array slice pass)
    outputs = []
    for i in range(b):
        rows = attn_pad[i, :counts[i], :n]
        outputs.append(rows.reshape(counts[i], h_attn, w_attn))
    return outputs


# ---------------------------------------------------------------------------
# Pure-JAX reference (mirrors the PyTorch module) for validation
# ---------------------------------------------------------------------------
def _reference_forward(features, features_ref, roi_mask, res_ratio=4,
                       pool_type="average", temp_softmax=1.0, use_scale=False):
    b, _, h, w = roi_mask.shape
    if res_ratio is None:
        h_attn, w_attn = features.shape[2], features.shape[3]
        r = h // h_attn
    else:
        h_attn, w_attn = h // res_ratio, w // res_ratio
        r = res_ratio
        features = _bilinear_resize_nchw(features, h_attn, w_attn)
        features_ref = _bilinear_resize_nchw(features_ref, h_attn, w_attn)
    c = features.shape[1]
    n = h_attn * w_attn
    pooled = _pool_mask(roi_mask, r, pool_type)
    keys = features.reshape(b, c, n).transpose(0, 2, 1)
    scale = float(c) ** (-0.5) if use_scale else 1.0
    pooled_np = np.asarray(pooled).reshape(b, -1)
    outs = []
    for i in range(b):
        weighted = (features_ref[i] * pooled[i]).reshape(c, -1).T          # [N, C]
        valid = np.nonzero(pooled_np[i] > 0)[0]
        q = weighted[jnp.asarray(valid, dtype=jnp.int32)]                  # [C_q, C]
        # exact f32 contraction (avoids TPU default dot precision ambiguity)
        sim = (q[:, None, :] * keys[i][None, :, :]).sum(-1) * scale / temp_softmax
        att = jax.nn.softmax(sim, axis=-1)
        outs.append(att.reshape(att.shape[0], h_attn, w_attn))
    return outs


# ---------------------------------------------------------------------------
if __name__ == "__main__":
    key = jax.random.PRNGKey(0)
    k1, k2, k3 = jax.random.split(key, 3)

    B, C = 2, 32
    H = W = 16                 # roi_mask spatial size
    Hf = Wf = 8                # feature spatial size (resized to H//4, W//4)

    features = jax.random.normal(k1, (B, C, Hf, Wf), dtype=jnp.float32)
    features_ref = jax.random.normal(k2, (B, C, Hf, Wf), dtype=jnp.float32)
    roi_mask = (jax.random.uniform(k3, (B, 1, H, W)) > 0.4).astype(jnp.float32)
    roi_mask = roi_mask.at[:, :, :4, :4].set(1.0)   # ensure >= 1 ROI token per batch

    refs = _reference_forward(features, features_ref, roi_mask, res_ratio=4,
                              pool_type="average", temp_softmax=0.5, use_scale=True)

    # strict correctness check: f32-compute / f32-output path vs pure-JAX reference
    outs_f32 = training_free_attention_forward(
        features, features_ref, roi_mask, res_ratio=4, pool_type="average",
        temp_softmax=0.5, use_scale=True,
        compute_dtype=jnp.float32, out_dtype=jnp.float32)
    for o, ref in zip(outs_f32, refs):
        assert o.shape == ref.shape, (o.shape, ref.shape)
        err = float(jnp.max(jnp.abs(o - ref)))
        assert err < 2e-3, err

    # bf16 fast path (default: bf16 MXU inputs, f32 softmax, bf16 output) vs reference
    outs_bf16 = training_free_attention_forward(
        features, features_ref, roi_mask, res_ratio=4, pool_type="average",
        temp_softmax=0.5, use_scale=True)
    for o, ref in zip(outs_bf16, refs):
        assert o.shape == ref.shape, (o.shape, ref.shape)
        err = float(jnp.max(jnp.abs(o.astype(jnp.float32) - ref)))
        assert err < 8e-2, err

    # default path: rows of the attention map must sum to ~1
    outs = training_free_attention_forward(
        features, features_ref, roi_mask, res_ratio=4, pool_type="average",
        temp_softmax=1.0, use_scale=False)
    for o in outs:
        jax.block_until_ready(o)
        row_sums = o.astype(jnp.float32).reshape(o.shape[0], -1).sum(-1)
        assert bool(jnp.allclose(row_sums, 1.0, atol=2e-2)), row_sums

    print("KERNEL_OK")
</pallas_src>

<mosaic_0001>
module attributes {stable_mosaic.version = 11 : i64} {
  func.func @_attn_softmax_kernel(%arg0: i32, %arg1: i32, %arg2: memref<1x16x32xf32, #tpu.memory_space<vmem>>, %arg3: memref<1x128x32xf32, #tpu.memory_space<vmem>>, %arg4: memref<1x128xf32, #tpu.memory_space<vmem>>, %arg5: memref<1x16x128xf32, #tpu.memory_space<vmem>>) attributes {dimension_semantics = [#tpu.dimension_semantics<parallel>, #tpu.dimension_semantics<parallel>], iteration_bounds = array<i64: 2, 1>, scalar_prefetch = 0 : i64, scratch_operands = 0 : i64, tpu.core_type = #tpu.core_type<tc>, window_params = [{transform_indices = @transform_0, window_bounds = array<i64: 1, 16, 32>}, {transform_indices = @transform_1, window_bounds = array<i64: 1, 128, 32>}, {pipeline_mode = #tpu.pipeline_mode<synchronous>, transform_indices = @transform_2, window_bounds = array<i64: 1, 128>}, {transform_indices = @transform_3, window_bounds = array<i64: 1, 16, 128>}]} {
    %c0 = arith.constant 0 : index
    %c0_0 = arith.constant 0 : index
    %c0_1 = arith.constant 0 : index
    %0 = vector.load %arg2[%c0, %c0_0, %c0_1] : memref<1x16x32xf32, #tpu.memory_space<vmem>>, vector<1x16x32xf32>
    %1 = vector.shape_cast %0 : vector<1x16x32xf32> to vector<16x32xf32>
    %c0_2 = arith.constant 0 : index
    %c0_3 = arith.constant 0 : index
    %c0_4 = arith.constant 0 : index
    %2 = vector.load %arg3[%c0_2, %c0_3, %c0_4] : memref<1x128x32xf32, #tpu.memory_space<vmem>>, vector<1x128x32xf32>
    %3 = vector.shape_cast %2 : vector<1x128x32xf32> to vector<128x32xf32>
    %cst = arith.constant 0.353553385 : f32
    %4 = vector.broadcast %cst : f32 to vector<16x32xf32>
    %5 = arith.mulf %1, %4 : vector<16x32xf32>
    %cst_5 = arith.constant dense<0.000000e+00> : vector<16x128xf32>
    %6 = tpu.matmul %5, %3, %cst_5 {dimension_numbers = #tpu.dot_dimension_numbers<[1], [1], [0], [0], [0, 0, 1, 0], [], []>} : vector<16x32xf32>, vector<128x32xf32>, vector<16x128xf32> -> vector<16x128xf32>
    %c0_6 = arith.constant 0 : index
    %c0_7 = arith.constant 0 : index
    %7 = vector.load %arg4[%c0_6, %c0_7] : memref<1x128xf32, #tpu.memory_space<vmem>>, vector<1x128xf32>
    %8 = vector.broadcast %7 : vector<1x128xf32> to vector<16x128xf32>
    %9 = arith.addf %6, %8 : vector<16x128xf32>
    %cst_8 = arith.constant dense<0xFF800000> : vector<16xf32>
    %10 = vector.multi_reduction <maximumf>, %9, %cst_8 [1] : vector<16x128xf32> to vector<16xf32>
    %11 = vector.shape_cast %10 : vector<16xf32> to vector<16x1xf32>
    %12 = vector.broadcast %11 : vector<16x1xf32> to vector<16x128xf32>
    %13 = arith.subf %9, %12 : vector<16x128xf32>
    %14 = math.exp %13 : vector<16x128xf32>
    %cst_9 = arith.constant dense<0.000000e+00> : vector<16xf32>
    %15 = vector.multi_reduction <add>, %14, %cst_9 [1] : vector<16x128xf32> to vector<16xf32>
    %16 = vector.shape_cast %15 : vector<16xf32> to vector<16x1xf32>
    %17 = tpu.reciprocal %16 {approx = true} : vector<16x1xf32> -> vector<16x1xf32>
    %18 = vector.broadcast %17 : vector<16x1xf32> to vector<16x128xf32>
    %19 = arith.mulf %14, %18 : vector<16x128xf32>
    %c0_10 = arith.constant 0 : index
    %c0_11 = arith.constant 0 : index
    %c0_12 = arith.constant 0 : index
    %20 = vector.load %arg5[%c0_10, %c0_11, %c0_12] : memref<1x16x128xf32, #tpu.memory_space<vmem>>, vector<1x16x128xf32>
    %21 = vector.shape_cast %20 : vector<1x16x128xf32> to vector<16x128xf32>
    %22 = vector.shape_cast %19 : vector<16x128xf32> to vector<1x16x128xf32>
    tpu.vector_store %arg5[%c0_10, %c0_11, %c0_12], %22 {strides = array<i32>} : memref<1x16x128xf32, #tpu.memory_space<vmem>>, vector<1x16x128xf32>,
    return
  }
  func.func @transform_0(%arg0: i32, %arg1: i32) -> (i32, i32, i32) {
    %c0_i32 = arith.constant 0 : i32
    %c0_i32_0 = arith.constant 0 : i32
    return %arg0, %arg1, %c0_i32 : i32, i32, i32
  }
  func.func @transform_1(%arg0: i32, %arg1: i32) -> (i32, i32, i32) {
    %c0_i32 = arith.constant 0 : i32
    %c0_i32_0 = arith.constant 0 : i32
    %c0_i32_1 = arith.constant 0 : i32
    return %arg0, %c0_i32, %c0_i32_0 : i32, i32, i32
  }
  func.func @transform_2(%arg0: i32, %arg1: i32) -> (i32, i32) {
    %c0_i32 = arith.constant 0 : i32
    %c0_i32_0 = arith.constant 0 : i32
    %c0_i32_1 = arith.constant 0 : i32
    return %c0_i32, %c0_i32_0 : i32, i32
  }
  func.func @transform_3(%arg0: i32, %arg1: i32) -> (i32, i32, i32) {
    %c0_i32 = arith.constant 0 : i32
    %c0_i32_0 = arith.constant 0 : i32
    return %arg0, %arg1, %c0_i32 : i32, i32, i32
  }
}

</mosaic_0001>

<bundles_post_ra>
// kernel: tpu_custom_call.1
= control target key start
LH: loop header
LB: loop body
LE: loop exit
PB: predicated region body
PF: predicated region fallthrough
CT: control target
= control target key end

     0   :  { %8 = vsyncpa [#allocation3], 0  ;;  %s830_s0 = inlined_call_operand.vmem [shape: f32[2,16,32], index: 0, kind: input, shape index: {}]   ;;  %s831_s1 = inlined_call_operand.vmem [shape: f32[2,128,32], index: 1, kind: input, shape index: {}]   ;;  %s832_s2 = inlined_call_operand.vmem [shape: f32[1,128], index: 2, kind: input, shape index: {}]   ;;  %s833_s3 = inlined_call_operand.hbm [shape: f32[2,16,128], index: 3, kind: output, shape index: {}]  }
   0x1   :  { %10 = vsyncpa [#allocation3 + $0x1], 0  ;;  %s671_s12 = smov 0   ;;  %s673_s13 = smov 0  }
   0x2   :  { %s675_s14 = smov 0   ;;  %s677_s15 = smov 0  }
   0x3   :  { %s679_s16 = smov 0   ;;  %s681_s17 = smov 0  }
   0x4 LB: > { %s451_s18 = sadd.s32 4294967295, %s647_s17   ;;  %s452_s19 = sadd.s32 4294967294, %s647_s17   ;;  %s647_s17 = sphi %s681_s17, %s16_s17   ;;  %s643_s16 = sphi %s679_s16, %s840_s16   ;;  %s639_s15 = sphi %s677_s15, %s839_s15   ;;  %s635_s14 = sphi %s675_s14, %s838_s14   ;;  %s631_s13 = sphi %s673_s13, %s837_s13   ;;  %s627_s12 = sphi %s671_s12, %s836_s12  }
   0x5   : > { %s28_s20 = sadd.s32 1, %s643_s16  ;;  %s112_s21 = sadd.s32 1, %s635_s14 }
   0x6   : > { %p30_p0 = scmp.ge.s32.totalorder %s28_s20, 2  ;;  %p122_p1 = scmp.ne.s32.totalorder %s635_s14, %s631_s13 }
   0x7   : > { %p123_p2 = scmp.eq.s32.totalorder %s451_s18, 1  ;;  %p128_p3 = scmp.ne.s32.totalorder %s631_s13, %s627_s12 }
   0x8   : > { %s842_s20 = smov (%p30_p0, %s28_s20), 0  ;;  %p129_p5 = scmp.eq.s32.totalorder %s452_s19, 1 }
   0x9   : > { %p711_p4 = por %p123_p2, %p122_p1  ;;  %s107_s23 = ssub.s32 %s643_s16, %s842_s20 }
   0xa   : > { %p455_p6 = scmp.ge.s32.totalorder %s647_s17, 1  ;;  %p110_p7 = scmp.eq.s32.totalorder %s107_s23, 0 }
   0xb   : > { %p718_p8 = por %p129_p5, %p128_p3  ;;  %p171_p9 = scmp.lt.s32.totalorder %s647_s17, 3 }
   0xc   : > { %s724_s25 = scalar_select %p110_p7, %s635_s14, %s112_s21  }
   0xd   : > { %p172_p10 = pnand %p455_p6, %p171_p9 }
   0xe   : > { %p205_p11 = scmp.lt.s32.totalorder (!%p172_p10), %s639_s15, 1  ;;  %s201_s10 = sand.u32 (!%p172_p10), 1, %s631_s13  }
   0xf   : > { %175 = sbr.rel (%p172_p10) target bundleno = 480 (0x1e0), region = 32  ;;  %s456_s11 = sshll.u32 (!%p172_p10), %s201_s10, 4 }
  0x10   : > { %s486_s18 = sshll.u32 (!%p172_p10), %s639_s15, 4  ;;  %s343_s29 = scalar_lea.sflag (!%p172_p10), [#allocation3], %s201_s10 }
  0x11   : > { %s356_s23 = scalar_lea.hbm (!%p172_p10), %s833_s3, %s486_s18  ;;  %s589_s6 = scalar_lea.hbm (!%p172_p10), %s833_s3, 32 }
  0x12   : > { %s359_s28 = sshll.u32 (!%p172_p10), %s356_s23, 4  ;;  %s360_s28 = int_to_ptr.hbm [resolvable:$true] %s359_s28 }
  0x14   : > { %s728_s26 = scalar_select %p205_p11, %s639_s15, 1  ;;  %vm244_vm0 = vcmask 261120   ;;  %v560_v20 = vld [vmem:[%s832_s2] ss:$0 sm:$0xff] }
  0x15   : > { %s583_s15 = sshra.s32 %s360_s28, 4  ;;  %s584_s15 = int_to_ptr.hbm [resolvable:$true] %s583_s15 }
  0x16   : > { %s485_s27 = sshll.u32 %s728_s26, 7  ;;  %s484_s4 = sshll.u32 %s728_s26, 4 }
  0x17   : > { %s734_s30 = scalar_lea.vmem %s831_s1, %s485_s27  ;;  %s212_s7 = scalar_lea.vmem %s830_s0, %s484_s4 }
  0x18   : > { %v237_v0 = vld [vmem:[%s734_s30 + $0x78] sm:$0xff]  ;;  %v236_v1 = vld [vmem:[%s734_s30 + $0x70] sm:$0xff]  ;;  %v235_v2 = vld [vmem:[%s734_s30 + $0x68] sm:$0xff]  ;;  %s203_s26 = scalar_lea.vmem [#allocation2], %s456_s11  ;;  %p590_p1 = scmp.lt.s32.totalorder %s584_s15, %s833_s3 }
  0x19   : > { %461 = vmatpush.xpose.msk.msra.mxu0 %vm244_vm0, %v237_v0  ;;  %487 = vmatpush.xpose.msk.msra.mxu1 %vm244_vm0, %v237_v0  ;;  %v234_v3 = vld [vmem:[%s734_s30 + $0x60] sm:$0xff]  ;;  %v233_v4 = vld [vmem:[%s734_s30 + $0x58] sm:$0xff]  ;;  %v232_v5 = vld [vmem:[%s734_s30 + $0x50] sm:$0xff]  ;;  %s357_s27 = sshll.u32 %s203_s26, 4  ;;  %s358_s27 = int_to_ptr.vmem [resolvable:$true] %s357_s27 }
  0x1a   : > { %v231_v6 = vld [vmem:[%s734_s30 + $0x48] sm:$0xff]  ;;  %v230_v7 = vld [vmem:[%s734_s30 + $0x40] sm:$0xff]  ;;  %v229_v8 = vld [vmem:[%s734_s30 + $0x38] sm:$0xff] }
  0x1b   : > { %v228_v9 = vld [vmem:[%s734_s30 + $0x30] sm:$0xff]  ;;  %v227_v10 = vld [vmem:[%s734_s30 + $0x28] sm:$0xff]  ;;  %v226_v11 = vld [vmem:[%s734_s30 + $0x20] sm:$0xff] }
  0x1c   : > { %v225_v12 = vld [vmem:[%s734_s30 + $0x18] sm:$0xff]  ;;  %v224_v13 = vld [vmem:[%s734_s30 + $0x10] sm:$0xff]  ;;  %v223_v14 = vld [vmem:[%s734_s30 + $0x8] sm:$0xff] }
  0x1d   : > { %462 = vmatpush.xpose.msk.msra.mxu0 %vm244_vm0, %v236_v1  ;;  %488 = vmatpush.xpose.msk.msra.mxu1 %vm244_vm0, %v236_v1  ;;  %v220_v15 = vld [vmem:[%s212_s7] sm:$0xff]  ;;  %v221_v16 = vld [vmem:[%s212_s7 + $0x8] sm:$0xff] }
  0x1e   : > { %v222_v17 = vld [vmem:[%s734_s30] sm:$0xff]  ;;  %v238_v18 = vmul.f32 0.35355338, %v220_v15  ;;  %v239_v19 = vmul.f32 0.35355338, %v221_v16  ;;  %s585_s30 = scalar_lea.hbm %s584_s15, 16 }
  0x1f   : > { %p586_p12 = scmp.ne.s32.totalorder %s584_s15, %s585_s30  ;;  %p591_p2 = scmp.lt.s32.totalorder %s589_s6, %s585_s30 }
  0x21   : > { %463 = vmatpush.xpose.msk.msra.mxu0 %vm244_vm0, %v235_v2  ;;  %489 = vmatpush.xpose.msk.msra.mxu1 %vm244_vm0, %v235_v2  ;;  %p587_p13 = pnand %p586_p12, %p711_p4  ;;  %p592_p3 = por %p591_p2, %p590_p1 }
  0x23   : > { %p588_p0 = pneg %p587_p13 }
  0x25   : > { %464 = vmatpush.xpose.msk.msra.mxu0 %vm244_vm0, %v234_v3  ;;  %490 = vmatpush.xpose.msk.msra.mxu1 %vm244_vm0, %v234_v3  ;;  %p593_p5 = pnand %p592_p3, %p588_p0 }
  0x29   : > { %465 = vmatpush.xpose.msk.msra.mxu0 %vm244_vm0, %v233_v4  ;;  %491 = vmatpush.xpose.msk.msra.mxu1 %vm244_vm0, %v233_v4 }
  0x2d   : > { %466 = vmatpush.xpose.msk.msra.mxu0 %vm244_vm0, %v232_v5  ;;  %492 = vmatpush.xpose.msk.msra.mxu1 %vm244_vm0, %v232_v5 }
  0x31   : > { %467 = vmatpush.xpose.msk.msra.mxu0 %vm244_vm0, %v231_v6  ;;  %493 = vmatpush.xpose.msk.msra.mxu1 %vm244_vm0, %v231_v6 }
  0x35   : > { %468 = vmatpush.xpose.msk.msra.mxu0 %vm244_vm0, %v230_v7  ;;  %494 = vmatpush.xpose.msk.msra.mxu1 %vm244_vm0, %v230_v7 }
  0x39   : > { %469 = vmatpush.xpose.msk.msra.mxu0 %vm244_vm0, %v229_v8  ;;  %495 = vmatpush.xpose.msk.msra.mxu1 %vm244_vm0, %v229_v8 }
  0x3d   : > { %470 = vmatpush.xpose.msk.msra.mxu0 %vm244_vm0, %v228_v9  ;;  %496 = vmatpush.xpose.msk.msra.mxu1 %vm244_vm0, %v228_v9 }
  0x41   : > { %471 = vmatpush.xpose.msk.msra.mxu0 %vm244_vm0, %v227_v10  ;;  %497 = vmatpush.xpose.msk.msra.mxu1 %vm244_vm0, %v227_v10 }
  0x45   : > { %472 = vmatpush.xpose.msk.msra.mxu0 %vm244_vm0, %v226_v11  ;;  %498 = vmatpush.xpose.msk.msra.mxu1 %vm244_vm0, %v226_v11 }
  0x49   : > { %473 = vmatpush.xpose.msk.msra.mxu0 %vm244_vm0, %v225_v12  ;;  %499 = vmatpush.xpose.msk.msra.mxu1 %vm244_vm0, %v225_v12 }
  0x4d   : > { %474 = vmatpush.xpose.msk.msra.mxu0 %vm244_vm0, %v224_v13  ;;  %500 = vmatpush.xpose.msk.msra.mxu1 %vm244_vm0, %v224_v13 }
  0x51   : > { %475 = vmatpush.xpose.msk.msra.mxu0 %vm244_vm0, %v223_v14  ;;  %501 = vmatpush.xpose.msk.msra.mxu1 %vm244_vm0, %v223_v14 }
  0x55   : > { %476 = vmatpush.xpose.msk.msra.mxu0 %vm244_vm0, %v222_v17  ;;  %502 = vmatpush.xpose.msk.msra.mxu1 %vm244_vm0, %v222_v17 }
  0x58   : > { %477 = vmatmul.msk.f32.vlgmr.msra.gmra.mxu0 %vm244_vm0, %v238_v18  ;;  %478 = vmatmul.msk.f32.vlgmr.msra.gmra.mxu1 %vm244_vm0, %v239_v19 }
  0xd5   : > { %v316_v21 = vpop.f32.mrf.mxu0  ;;  %v319_v23 = vpop.f32.mrf.mxu1 }
  0xd6   : > { %v317_v22 = vadd.f32 %v560_v20, %v316_v21  ;;  %v320_v24 = vadd.f32 %v560_v20, %v319_v23 }
  0xd8   : > { %322 = vmax.xlane.f32.xlu0 %v317_v22 }
  0xe0   : > { %324 = vmax.xlane.f32.xlu0 %v320_v24 }
 0x14b   : > { %v323_v25 = vpop.xlane.xlu0 %322 }
 0x14c   : > { %v326_v26 = vsub.f32 %v317_v22, %v323_v25 }
 0x14e   : > { %v328_v27 = vmul.f32 1.442695, %v326_v26 }
 0x150   : > { %561 = vpow2.f32 %v328_v27 }
 0x153   : > { %v325_v28 = vpop.xlane.xlu0 %324 }
 0x154   : > { %v327_v29 = vsub.f32 %v320_v24, %v325_v28 }
 0x156   : > { %v562_v30 = vpop.eup %561  ;;  %v330_v31 = vmul.f32 1.442695, %v327_v29 }
 0x157   : > { %332 = vadd.xlane.f32.xlu1 %v562_v30 }
 0x158   : > { %563 = vpow2.f32 %v330_v31 }
 0x15e   : > { %v564_v32 = vpop.eup %563 }
 0x15f   : > { %334 = vadd.xlane.f32.xlu1 %v564_v32 }
 0x1ca   : > { %v333_v33 = vpop.xlane.xlu1 %332 }
 0x1cb   : > { %565 = vrcp.f32 %v333_v33 }
 0x1d1   : > { %v566_v34 = vpop.eup %565 }
 0x1d2   : > { %v338_v35 = vmul.f32 %v566_v34, %v562_v30  ;;  %v335_v36 = vpop.xlane.xlu1 %334 }
 0x1d3   : > { %567 = vrcp.f32 %v335_v36 }
 0x1d4   : > { %340 = vst [vmem:[%s203_s26] sm:$0xff] %v338_v35 }
 0x1d9   : > { %v568_v37 = vpop.eup %567 }
 0x1da   : > { %v339_v38 = vmul.f32 %v568_v37, %v564_v32 }
 0x1dc   : > { %341 = vst [vmem:[%s203_s26 + $0x8] sm:$0xff] %v339_v38 }
 0x1dd   : > { %596 = shalt.err (!%p593_p5)
}
 0x1de   : > { %s649_s9 = smov 128   ;;  %s650_s10 = smov 8  }
 0x1df   : > { %503 = dma.vmem_to_hbm [thread:$0]  (%p711_p4), %s358_s27, 256, %s360_s28, %s343_s29, %s649_s9, %s649_s9, %s650_s10  }
 0x1e0 PF: > { %p509_p6 = scmp.ge.s32.totalorder %s647_s17, 2  ;;  %s374_s11 = sand.u32 1, %s627_s12  }
 0x1e1   : > { %s375_s18 = scalar_lea.sflag [#allocation3], %s374_s11 }
 0x1e2   : > { %p506_p7 = pnand %p509_p6, %p718_p8 }
 0x1e4   : > { %p507_p9 = pneg %p506_p7 }
 0x1e6   : > { %622 = dma.done.wait (%p507_p9), %s375_s18, 256  }
 0x1e7   : > { %624 = vsyncadd (%p507_p9), %s375_s18, 4294967040  ;;  %s16_s17 = sadd.s32 1, %s647_s17   ;;  %s836_s12 = smov %s631_s13 }
 0x1e8   : > { %p13_p10 = scmp.ge.s32.totalorder %s16_s17, 4   ;;  %s837_s13 = smov %s635_s14 }
 0x1e9   : > { %s838_s14 = smov %s724_s25  ;;  %s839_s15 = smov %s643_s16 }
 0x1ea   : > { %s840_s16 = smov %s842_s20  ;;  %15 = sbr.rel (!%p13_p10) target bundleno = 4 (0x4), region = 70 }
 0x1ef   :  { %381 = vsyncpa [#allocation3], 1 }
 0x1f0   :  { %383 = vsyncpa [#allocation3 + $0x1], 1 }

</bundles_post_ra>
